<compile_context>
chip_gen: v7x
topology: tpu7x:2x2x1
jax: 0.10.0
libtpu: 0.0.40
codegen_flags: <defaults>
</compile_context>

<pallas_src>
import jax
import jax.numpy as jnp
from jax.experimental import pallas as pl
from jax.experimental.pallas import tpu as pltpu


def _round_up(n, m):
    return (n + m - 1) // m * m


def _cdiv(a, b):
    return (a + b - 1) // b


def _vmem_capacity_bytes():
    try:
        return int(pltpu.get_tpu_info().vmem_capacity_bytes)
    except Exception:
        return 64 * 1024 * 1024  # conservative (v7x per-TensorCore)


def adapter_kernel(x_ref, w1_ref, b1_ref, w2_ref, b2_ref, o_ref):
    # x_ref:  (tm, Hp)  x.dtype  tile of flattened input rows
    # w1_ref: (Hp, Bp)  bf16     down-projection weight (resident)
    # b1_ref: (1,  Bp)  f32      down-projection bias
    # w2_ref: (Bp, Hp)  bf16     up-projection weight (resident)
    # b2_ref: (1,  Hp)  f32      up-projection bias
    x = x_ref[...]
    x_f32 = x.astype(jnp.float32)                         # kept for residual
    h = jnp.dot(x.astype(jnp.bfloat16), w1_ref[...],
                preferred_element_type=jnp.float32)       # MXU bf16 -> f32 acc
    h = jnp.maximum(h + b1_ref[...], 0.0)                 # bias + ReLU in f32
    y = jnp.dot(h.astype(jnp.bfloat16), w2_ref[...],
                preferred_element_type=jnp.float32)       # MXU bf16 -> f32 acc
    o_ref[...] = (y + b2_ref[...] + x_f32).astype(o_ref.dtype)


def prepare_adapter_params(w1, b1, w2, b2):
    """Pad channel dims to multiples of 128 and cast weights to bf16, once."""
    H, B = w1.shape
    Hp = _round_up(H, 128)
    Bp = _round_up(B, 128)
    w1p = jnp.zeros((Hp, Bp), jnp.bfloat16).at[:H, :B].set(w1.astype(jnp.bfloat16))
    w2p = jnp.zeros((Bp, Hp), jnp.bfloat16).at[:B, :H].set(w2.astype(jnp.bfloat16))
    b1p = jnp.zeros((1, Bp), jnp.float32).at[0, :B].set(b1.astype(jnp.float32))
    b2p = jnp.zeros((1, Hp), jnp.float32).at[0, :H].set(b2.astype(jnp.float32))
    return dict(w1p=w1p, b1p=b1p, w2p=w2p, b2p=b2p, H=H, B=B, Hp=Hp, Bp=Bp)


def adapter_layer(x, params, *, tm=None):
    """x: [..., H]. params: output of prepare_adapter_params."""
    orig_shape = x.shape
    H, Hp, Bp = params["H"], params["Hp"], params["Bp"]
    assert orig_shape[-1] == H, "last dim of x must equal input_size"

    xf = x.reshape(-1, H)
    M = xf.shape[0]
    x_itemsize = jnp.dtype(x.dtype).itemsize

    # Lane-dense input: only copy/pad when H is not already a multiple of 128.
    pad_channels = (Hp != H)
    xin = jnp.zeros((M, Hp), x.dtype).at[:, :H].set(xf) if pad_channels else xf

    # Row tile: big for bandwidth, smaller for very large H (v7x VMEM budget);
    # for small M shrink it so the parallel grid has >= 2 steps (both v7x TCs).
    if tm is None:
        tm = 256 if Hp >= 4096 else 512
    if M <= tm:
        tm_eff = max(8, _round_up(_cdiv(M, 2), 8))
    else:
        tm_eff = tm
    grid = (_cdiv(M, tm_eff),)   # ragged last tile handled by Pallas masking

    # Constant (grid-invariant) blocks: single-buffer them when they are large.
    single_buf_weights = Hp >= 4096

    def const_spec(shape):
        if single_buf_weights:
            return pl.BlockSpec(shape, lambda i: (0, 0),
                                pipeline_mode=pl.Buffered(1))
        return pl.BlockSpec(shape, lambda i: (0, 0))

    # VMEM budget including in-kernel temporaries, clamped to the chip's VMEM.
    weight_bufs = 1 if single_buf_weights else 2
    vmem_est = (
        2 * tm_eff * Hp * x_itemsize          # double-buffered x tiles
        + 2 * tm_eff * Hp * x_itemsize        # double-buffered out tiles
        + tm_eff * Hp * 2                     # bf16 copy of x tile
        + tm_eff * Bp * (4 + 2)               # h (f32) + its bf16 copy
        + tm_eff * Hp * 4                     # y (f32) before store
        + weight_bufs * (Hp * Bp + Bp * Hp) * 2
        + 2 * weight_bufs * (Bp + Hp) * 4
    )
    vmem_cap = _vmem_capacity_bytes()
    vmem_limit = max(16 * 1024 * 1024, int(vmem_est * 1.25))
    vmem_limit = int(min(vmem_limit, int(vmem_cap * 0.75)))

    cost = pl.CostEstimate(
        flops=4 * M * Hp * Bp,                               # two matmuls
        transcendentals=0,
        bytes_accessed=(M * Hp * x_itemsize                  # x stream
                        + M * Hp * x_itemsize                # out stream
                        + 2 * Hp * Bp * 2                    # bf16 weights (once)
                        + (Bp + Hp) * 4),                    # biases
    )

    out = pl.pallas_call(
        adapter_kernel,
        out_shape=jax.ShapeDtypeStruct((M, Hp), x.dtype),
        grid_spec=pltpu.PrefetchScalarGridSpec(
            num_scalar_prefetch=0,
            grid=grid,
            in_specs=[
                pl.BlockSpec((tm_eff, Hp), lambda i: (i, 0)),  # x rows tile
                const_spec((Hp, Bp)),                          # w1 (resident)
                const_spec((1, Bp)),                           # b1
                const_spec((Bp, Hp)),                          # w2 (resident)
                const_spec((1, Hp)),                           # b2
            ],
            out_specs=pl.BlockSpec((tm_eff, Hp), lambda i: (i, 0)),
        ),
        compiler_params=pltpu.CompilerParams(
            dimension_semantics=("parallel",),
            vmem_limit_bytes=vmem_limit,
        ),
        cost_estimate=cost,
    )(xin, params["w1p"], params["b1p"], params["w2p"], params["b2p"])

    if pad_channels:
        out = out[:, :H]
    return out.reshape(orig_shape)


def init_params(key, input_size, bottleneck_size):
    # PyTorch nn.Linear default init: U(-1/sqrt(fan_in), 1/sqrt(fan_in))
    k1, k2, k3, k4 = jax.random.split(key, 4)
    bound1 = 1.0 / jnp.sqrt(input_size)
    bound2 = 1.0 / jnp.sqrt(bottleneck_size)
    w1 = jax.random.uniform(k1, (input_size, bottleneck_size), jnp.float32,
                            -bound1, bound1)
    b1 = jax.random.uniform(k2, (bottleneck_size,), jnp.float32, -bound1, bound1)
    w2 = jax.random.uniform(k3, (bottleneck_size, input_size), jnp.float32,
                            -bound2, bound2)
    b2 = jax.random.uniform(k4, (input_size,), jnp.float32, -bound2, bound2)
    return w1, b1, w2, b2


if __name__ == "__main__":
    key = jax.random.PRNGKey(0)
    batch, seq, hidden, bottleneck = 2, 8, 32, 16

    kx, kp = jax.random.split(key)
    x = jax.random.normal(kx, (batch, seq, hidden), jnp.float32)
    w1, b1, w2, b2 = init_params(kp, hidden, bottleneck)

    # Pad/cast weights once, outside the per-call path.
    params = prepare_adapter_params(w1, b1, w2, b2)

    out = adapter_layer(x, params)
    out = jax.block_until_ready(out)

    # Pure-JAX f32 reference; bf16 matmul inputs introduce a small bounded error.
    ref = jnp.maximum(x @ w1 + b1, 0.0) @ w2 + b2 + x
    assert out.shape == x.shape
    assert jnp.allclose(out, ref, atol=3e-2, rtol=3e-2), (
        float(jnp.max(jnp.abs(out - ref))))

    print("KERNEL_OK")
</pallas_src>

<mosaic_0001>
module attributes {stable_mosaic.version = 11 : i64} {
  func.func @adapter_kernel(%arg0: i32, %arg1: memref<8x128xf32, #tpu.memory_space<vmem>>, %arg2: memref<128x128xbf16, #tpu.memory_space<vmem>>, %arg3: memref<1x128xf32, #tpu.memory_space<vmem>>, %arg4: memref<128x128xbf16, #tpu.memory_space<vmem>>, %arg5: memref<1x128xf32, #tpu.memory_space<vmem>>, %arg6: memref<8x128xf32, #tpu.memory_space<vmem>>) attributes {dimension_semantics = [#tpu.dimension_semantics<parallel>], iteration_bounds = array<i64: 2>, scalar_prefetch = 0 : i64, scratch_operands = 0 : i64, tpu.core_type = #tpu.core_type<tc>, window_params = [{transform_indices = @transform_0, window_bounds = array<i64: 8, 128>}, {pipeline_mode = #tpu.pipeline_mode<synchronous>, transform_indices = @transform_1, window_bounds = array<i64: 128, 128>}, {pipeline_mode = #tpu.pipeline_mode<synchronous>, transform_indices = @transform_2, window_bounds = array<i64: 1, 128>}, {pipeline_mode = #tpu.pipeline_mode<synchronous>, transform_indices = @transform_3, window_bounds = array<i64: 128, 128>}, {pipeline_mode = #tpu.pipeline_mode<synchronous>, transform_indices = @transform_4, window_bounds = array<i64: 1, 128>}, {transform_indices = @transform_5, window_bounds = array<i64: 8, 128>}]} {
    %c0 = arith.constant 0 : index
    %c0_0 = arith.constant 0 : index
    %0 = vector.load %arg1[%c0, %c0_0] : memref<8x128xf32, #tpu.memory_space<vmem>>, vector<8x128xf32>
    %1 = arith.truncf %0 : vector<8x128xf32> to vector<8x128xbf16>
    %c0_1 = arith.constant 0 : index
    %c0_2 = arith.constant 0 : index
    %2 = vector.load %arg2[%c0_1, %c0_2] : memref<128x128xbf16, #tpu.memory_space<vmem>>, vector<128x128xbf16>
    %cst = arith.constant dense<0.000000e+00> : vector<8x128xf32>
    %3 = tpu.matmul %1, %2, %cst {dimension_numbers = #tpu.dot_dimension_numbers<[1], [0], [0], [1], [0, 0, 1, 1], [], []>} : vector<8x128xbf16>, vector<128x128xbf16>, vector<8x128xf32> -> vector<8x128xf32>
    %c0_3 = arith.constant 0 : index
    %c0_4 = arith.constant 0 : index
    %4 = vector.load %arg3[%c0_3, %c0_4] : memref<1x128xf32, #tpu.memory_space<vmem>>, vector<1x128xf32>
    %5 = vector.broadcast %4 : vector<1x128xf32> to vector<8x128xf32>
    %6 = arith.addf %3, %5 : vector<8x128xf32>
    %cst_5 = arith.constant 0.000000e+00 : f32
    %7 = vector.broadcast %cst_5 : f32 to vector<8x128xf32>
    %8 = arith.maximumf %6, %7 : vector<8x128xf32>
    %9 = arith.truncf %8 : vector<8x128xf32> to vector<8x128xbf16>
    %c0_6 = arith.constant 0 : index
    %c0_7 = arith.constant 0 : index
    %10 = vector.load %arg4[%c0_6, %c0_7] : memref<128x128xbf16, #tpu.memory_space<vmem>>, vector<128x128xbf16>
    %cst_8 = arith.constant dense<0.000000e+00> : vector<8x128xf32>
    %11 = tpu.matmul %9, %10, %cst_8 {dimension_numbers = #tpu.dot_dimension_numbers<[1], [0], [0], [1], [0, 0, 1, 1], [], []>} : vector<8x128xbf16>, vector<128x128xbf16>, vector<8x128xf32> -> vector<8x128xf32>
    %c0_9 = arith.constant 0 : index
    %c0_10 = arith.constant 0 : index
    %12 = vector.load %arg5[%c0_9, %c0_10] : memref<1x128xf32, #tpu.memory_space<vmem>>, vector<1x128xf32>
    %13 = vector.broadcast %12 : vector<1x128xf32> to vector<8x128xf32>
    %14 = arith.addf %11, %13 : vector<8x128xf32>
    %15 = arith.addf %14, %0 : vector<8x128xf32>
    %c0_11 = arith.constant 0 : index
    %c0_12 = arith.constant 0 : index
    %16 = vector.load %arg6[%c0_11, %c0_12] : memref<8x128xf32, #tpu.memory_space<vmem>>, vector<8x128xf32>
    tpu.vector_store %arg6[%c0_11, %c0_12], %15 {strides = array<i32>} : memref<8x128xf32, #tpu.memory_space<vmem>>, vector<8x128xf32>,
    return
  }
  func.func @transform_0(%arg0: i32) -> (i32, i32) {
    %c0_i32 = arith.constant 0 : i32
    %c0_i32_0 = arith.constant 0 : i32
    return %arg0, %c0_i32 : i32, i32
  }
  func.func @transform_1(%arg0: i32) -> (i32, i32) {
    %c0_i32 = arith.constant 0 : i32
    %c0_i32_0 = arith.constant 0 : i32
    %c0_i32_1 = arith.constant 0 : i32
    return %c0_i32, %c0_i32_0 : i32, i32
  }
  func.func @transform_2(%arg0: i32) -> (i32, i32) {
    %c0_i32 = arith.constant 0 : i32
    %c0_i32_0 = arith.constant 0 : i32
    %c0_i32_1 = arith.constant 0 : i32
    return %c0_i32, %c0_i32_0 : i32, i32
  }
  func.func @transform_3(%arg0: i32) -> (i32, i32) {
    %c0_i32 = arith.constant 0 : i32
    %c0_i32_0 = arith.constant 0 : i32
    %c0_i32_1 = arith.constant 0 : i32
    return %c0_i32, %c0_i32_0 : i32, i32
  }
  func.func @transform_4(%arg0: i32) -> (i32, i32) {
    %c0_i32 = arith.constant 0 : i32
    %c0_i32_0 = arith.constant 0 : i32
    %c0_i32_1 = arith.constant 0 : i32
    return %c0_i32, %c0_i32_0 : i32, i32
  }
  func.func @transform_5(%arg0: i32) -> (i32, i32) {
    %c0_i32 = arith.constant 0 : i32
    %c0_i32_0 = arith.constant 0 : i32
    return %arg0, %c0_i32 : i32, i32
  }
}

</mosaic_0001>

<bundles_post_ra>
// kernel: tpu_custom_call.1
= control target key start
LH: loop header
LB: loop body
LE: loop exit
PB: predicated region body
PF: predicated region fallthrough
CT: control target
= control target key end

     0   :  { %10 = vsyncpa [#allocation3], 0  ;;  %s1218_s0 = inlined_call_operand.hbm [shape: f32[16,128], index: 0, kind: input, shape index: {}]   ;;  %s1219_s1 = inlined_call_operand.hbm [shape: bf16[128,128], index: 1, kind: input, shape index: {}]   ;;  %s1220_s2 = inlined_call_operand.vmem [shape: f32[1,128], index: 2, kind: input, shape index: {}]   ;;  %s1221_s3 = inlined_call_operand.hbm [shape: bf16[128,128], index: 3, kind: input, shape index: {}]   ;;  %s1222_s4 = inlined_call_operand.vmem [shape: f32[1,128], index: 4, kind: input, shape index: {}]   ;;  %s1223_s5 = inlined_call_operand.hbm [shape: f32[16,128], index: 5, kind: output, shape index: {}]  }
   0x1   :  { %12 = vsyncpa [#allocation3 + $0x1], 0 }
   0x2   :  { %13 = vsyncpa [#allocation6], 0 }
   0x3   :  { %14 = vsyncpa [#allocation4], 0 }
   0x4   :  { %16 = vsyncpa [#allocation4 + $0x1], 0  ;;  %s976_s18 = smov 0   ;;  %s978_s19 = smov 0  }
   0x5   :  { %s980_s20 = smov 0   ;;  %s982_s21 = smov 0  }
   0x6 LB: > { %s997_s22 = sadd.s32 4294967295, %s936_s21   ;;  %s601_s23 = sadd.s32 4294967294, %s936_s21   ;;  %s936_s21 = sphi %s982_s21, %s1243_s21   ;;  %s932_s20 = sphi %s980_s20, %s1242_s20   ;;  %s928_s19 = sphi %s978_s19, %s1241_s19   ;;  %s924_s18 = sphi %s976_s18, %s1240_s18  }
   0x7   : > { %p42_p0 = scmp.ne.s32.totalorder %s928_s19, %s924_s18  ;;  %p1224_p1 = scmp.eq.s32.totalorder %s997_s22, 0 }
   0x8   : > { %p156_p3 = scmp.eq.s32.totalorder %s601_s23, 1  ;;  %p602_p5 = scmp.ge.s32.totalorder %s936_s21, 1 }
   0x9   : > { %p1006_p4 = por %p1224_p1, %p42_p0  ;;  %p163_p7 = scmp.lt.s32.totalorder %s936_s21, 3 }
   0xa   : > { %p1011_p6 = por %p156_p3, %p42_p0  ;;  %s938_s27 = smov [#allocation5]  }
   0xb   : > { %s1227_s24 = scalar_select %p1006_p4, 1, 0 }
   0xc   : > { %s1228_s25 = scalar_select %p1011_p6, 1, 0 }
   0xd   : > { %p1016_p8 = pnand %p602_p5, %p163_p7  ;;  %s175_s28 = sshll.u32 %s938_s27, 4  ;;  %s1020_s28 = int_to_ptr.vmem [resolvable:$true] %s175_s28 }
   0xe   : > { %s939_s30 = smov [#allocation7]   ;;  %s780_s9 = scalar_lea.hbm %s1219_s1, 1024 }
   0xf   : > { %p705_p9 = pneg %p1016_p8  ;;  %s191_s6 = sshll.u32 %s939_s30, 4  ;;  %s1031_s6 = int_to_ptr.vmem [resolvable:$true] %s191_s6 }
  0x10   : > { %p781_p12 = scmp.ne.s32.totalorder %s1219_s1, %s780_s9  ;;  %p787_p5 = scmp.lt.u32.totalorder %s780_s9, %s1219_s1 }
  0x11   : > { %p1027_p11 = pnand %p705_p9, %p1224_p1 }
  0x13   : > { %p782_p13 = pneg %p1027_p11 }
  0x15   : > { %p783_p0 = pnand %p782_p13, %p781_p12 }
  0x17   : > { %p784_p3 = pneg %p783_p0 }
  0x19   : > { %p789_p7 = pnand %p787_p5, %p784_p3 }
  0x1b   : > { %792 = shalt.err (!%p789_p7)
}
  0x1c   : > { %s793_s14 = scalar_lea.vmem %s1020_s28, 1024  ;;  %p801_p2 = scmp.lt.s32.totalorder %s1020_s28, %s1020_s28 }
  0x1d   : > { %p794_p9 = scmp.ne.s32.totalorder %s1020_s28, %s793_s14  ;;  %p802_p12 = scmp.lt.s32.totalorder %s793_s14, %s793_s14 }
  0x1f   : > { %p796_p10 = pnand %p794_p9, %p782_p13  ;;  %p803_p0 = por %p802_p12, %p801_p2 }
  0x21   : > { %p797_p1 = pneg %p796_p10 }
  0x23   : > { %p804_p6 = pnand %p803_p0, %p797_p1 }
  0x25   : > { %807 = shalt.err (!%p804_p6)
}
  0x26   : > { %s940_s15 = smov 64   ;;  %s941_s16 = smov 4  }
  0x27   : > { %708 = dma.hbm_to_vmem [thread:$0]  (!%p1027_p11), %s1219_s1, 1024, %s1020_s28, [#allocation6], %s940_s15, %s940_s15, %s941_s16  }
  0x28   : > { %s808_s7 = scalar_lea.hbm %s1221_s3, 1024 }
  0x29   : > { %p809_p2 = scmp.ne.s32.totalorder %s1221_s3, %s808_s7  ;;  %p815_p10 = scmp.lt.u32.totalorder %s808_s7, %s1221_s3 }
  0x2b   : > { %p811_p1 = pnand %p809_p2, %p782_p13 }
  0x2d   : > { %p812_p6 = pneg %p811_p1 }
  0x2f   : > { %p817_p3 = pnand %p815_p10, %p812_p6 }
  0x31   : > { %820 = shalt.err (!%p817_p3)
}
  0x32   : > { %s821_s28 = scalar_lea.vmem %s1031_s6, 1024  ;;  %p829_p12 = scmp.lt.s32.totalorder %s1031_s6, %s1031_s6 }
  0x33   : > { %p822_p5 = scmp.ne.s32.totalorder %s1031_s6, %s821_s28  ;;  %p830_p0 = scmp.lt.s32.totalorder %s821_s28, %s821_s28 }
  0x35   : > { %p824_p7 = pnand %p822_p5, %p782_p13  ;;  %p831_p2 = por %p830_p0, %p829_p12 }
  0x37   : > { %p825_p9 = pneg %p824_p7 }
  0x39   : > { %p832_p1 = pnand %p831_p2, %p825_p9 }
  0x3b   : > { %835 = shalt.err (!%p832_p1)
}
  0x3c   : > { %711 = dma.hbm_to_vmem [thread:$0]  (!%p1027_p11), %s1221_s3, 1024, %s1031_s6, [#allocation6], %s940_s15, %s940_s15, %s941_s16  }
  0x3d   : > { %s1086_s14 = sadd.s32 1, %s936_s21   ;;  %s29_s29 = sadd.s32 1, %s932_s20 }
  0x3e   : > { %s26_s17 = ssub.s32 %s936_s21, %s1086_s14  ;;  %p36_p13 = scmp.ne.s32.totalorder %s932_s20, %s928_s19 }
  0x3f   : > { %p27_p6 = scmp.eq.s32.totalorder %s26_s17, 0  ;;  %p37_p10 = scmp.eq.s32.totalorder %s936_s21, 0 }
  0x40   : > { %p1231_p3 = scmp.eq.s32.totalorder %s997_s22, 1  ;;  %p722_p7 = scmp.lt.s32.totalorder %s936_s21, 2 }
  0x41   : > { %s1102_s27 = scalar_select %p27_p6, %s932_s20, %s29_s29  }
  0x42   : > { %p1096_p5 = por %p1231_p3, %p36_p13  ;;  %p38_p9 = por %p37_p10, %p36_p13 }
  0x43   : > { %s208_s30 = sand.u32 1, %s932_s20   ;;  %s607_s6 = sshll.u32 %s936_s21, 7 }
  0x44   : > { %s1232_s23 = scalar_select %p1096_p5, 1, 0 }
  0x45   : > { %s606_s7 = sshll.u32 %s208_s30, 3  ;;  %s1109_s8 = scalar_lea.hbm %s1218_s0, %s607_s6 }
  0x46   : > { %s212_s9 = scalar_lea.vmem [#allocation2], %s606_s7  ;;  %p1113_p11 = pnand %p722_p7, %p38_p9 }
  0x47   : > { %s219_s10 = sshll.u32 %s212_s9, 4  ;;  %s209_s28 = scalar_lea.sflag [#allocation3], %s208_s30  ;;  %s1111_s10 = int_to_ptr.vmem [resolvable:$true] %s219_s10 }
  0x48   : > { %s836_s12 = scalar_lea.hbm %s1109_s8, 128  ;;  %p838_p0 = pneg %p1113_p11 }
  0x49   : > { %p837_p12 = scmp.ne.s32.totalorder %s1109_s8, %s836_s12  ;;  %s841_s17 = scalar_lea.hbm %s1218_s0, 256 }
  0x4a   : > { %p842_p13 = scmp.lt.u32.totalorder %s1109_s8, %s1218_s0  ;;  %p843_p6 = scmp.lt.u32.totalorder %s841_s17, %s836_s12 }
  0x4b   : > { %p839_p2 = pnand %p838_p0, %p837_p12  ;;  %p845_p3 = scmp.lt.u32.totalorder %s836_s12, %s1109_s8 }
  0x4c   : > { %p844_p10 = por %p843_p6, %p842_p13 }
  0x4d   : > { %p840_p1 = pneg %p839_p2 }
  0x4e   : > { %p846_p7 = por %p845_p3, %p844_p10 }
  0x50   : > { %p847_p9 = pnand %p846_p7, %p840_p1 }
  0x52   : > { %850 = shalt.err (!%p847_p9)
}
  0x53   : > { %s851_s30 = scalar_lea.vmem %s1111_s10, 128  ;;  %s942_s15 = smov [#allocation2]  }
  0x54   : > { %p852_p12 = scmp.ne.s32.totalorder %s1111_s10, %s851_s30  ;;  %s856_s16 = sshll.u32 %s942_s15, 4  ;;  %s857_s16 = int_to_ptr.vmem [resolvable:$false] %s856_s16 }
  0x55   : > { %s858_s9 = scalar_lea.vmem %s857_s16, 256  ;;  %p859_p4 = scmp.lt.s32.totalorder %s1111_s10, %s857_s16 }
  0x56   : > { %p854_p2 = pnand %p852_p12, %p838_p0  ;;  %p860_p13 = scmp.lt.s32.totalorder %s858_s9, %s851_s30 }
  0x58   : > { %p855_p5 = pneg %p854_p2  ;;  %p861_p6 = por %p860_p13, %p859_p4 }
  0x5a   : > { %p862_p10 = pnand %p861_p6, %p855_p5 }
  0x5c   : > { %865 = shalt.err (!%p862_p10)
}
  0x5d   : > { %715 = dma.hbm_to_vmem [thread:$0]  (!%p1113_p11), %s1109_s8, 128, %s1111_s10, %s209_s28  }
  0x5e   : > { %228 = sbr.rel (%p1016_p8) target bundleno = 587 (0x24b), region = 40  ;;  %s1145_s12 = sand.u32 (!%p1016_p8), 1, %s928_s19  }
  0x5f   : > { %s609_s13 = sshll.u32 (!%p1016_p8), %s1145_s12, 3  ;;  %s231_s29 = scalar_lea.sflag (!%p1016_p8), [#allocation3], %s1145_s12 }
  0x60   : > { %s1151_s17 = scalar_lea.vmem (!%p1016_p8), [#allocation2], %s609_s13  ;;  %p1234_p4 = scmp.ne.s32.totalorder (!%p1016_p8), %s1227_s24, 0 }
  0x65   : > { %911 = dma.done.wait (%p1234_p4), %s231_s29, 128  }
  0x66   : > { %913 = vsyncadd (%p1234_p4), %s231_s29, 4294967168  ;;  %p1235_p5 = scmp.eq.s32.totalorder %s997_s22, 0 }
  0x68   : > { %915 = dma.done.wait (%p1235_p5), [#allocation6], 2048   ;;  %p1236_p8 = pmov %p1235_p5 }
  0x69   : > { %v943_v0 = vmov 0.0   ;;  %vm944_vm0 = vmmov 0   ;;  %v764_v1 = vld [vmem:[#allocation5] sm:$0xff]   ;;  %v765_v2 = vld [vmem:[#allocation5 + $0x8] sm:$0xff]   ;;  %v766_v3 = vld [vmem:[#allocation5 + $0x10] sm:$0xff]   ;;  %s632_s11 = sshll.u32 %s997_s22, 7 }
  0x6a   : > { %917 = vsyncadd (%p1236_p8), [#allocation6], 4294965248  ;;  %653 = vmatprep.subr.bf16.mxu0 %v943_v0  ;;  %669 = vmatprep.mubr.msk.bf16.mxu0 %vm944_vm0, %v943_v0  ;;  %v772_v4 = vld [vmem:[#allocation7] sm:$0xff]   ;;  %v767_v5 = vld [vmem:[#allocation5 + $0x18] sm:$0xff]   ;;  %s268_s28 = scalar_lea.vmem [#allocation8], %s609_s13  ;;  %s1174_s15 = scalar_lea.hbm %s1223_s5, %s632_s11 }
  0x6b   : > { %673 = vmatprep.subr.bf16.mxu1 %v943_v0  ;;  %689 = vmatprep.mubr.msk.bf16.mxu1 %vm944_vm0, %v943_v0  ;;  %v773_v6 = vld [vmem:[#allocation7 + $0x8] sm:$0xff]   ;;  %v768_v7 = vld [vmem:[#allocation5 + $0x20] sm:$0xff]   ;;  %v774_v8 = vld [vmem:[#allocation7 + $0x10] sm:$0xff]   ;;  %s512_s7 = sshll.u32 %s268_s28, 4  ;;  %s499_s22 = scalar_lea.sflag [#allocation4], %s1145_s12  ;;  %s1176_s7 = int_to_ptr.vmem [resolvable:$true] %s512_s7 }
  0x6c   : > { %654 = vmatpush3.bf16.msra.mxu0 %v764_v1  ;;  %674 = vmatpush3.bf16.msra.mxu1 %v772_v4  ;;  %v769_v9 = vld [vmem:[#allocation5 + $0x28] sm:$0xff]   ;;  %v775_v10 = vld [vmem:[#allocation7 + $0x18] sm:$0xff]   ;;  %v770_v11 = vld [vmem:[#allocation5 + $0x30] sm:$0xff]   ;;  %s866_s16 = scalar_lea.vmem %s1176_s7, 128  ;;  %p1237_p0 = scmp.ne.s32.totalorder %s1232_s23, 0 }
  0x6d   : > { %655 = vmatprep.subr.bf16.mxu0 %v943_v0  ;;  %675 = vmatprep.subr.bf16.mxu1 %v943_v0  ;;  %v776_v12 = vld [vmem:[#allocation7 + $0x20] sm:$0xff]   ;;  %v771_v13 = vld [vmem:[#allocation5 + $0x38] sm:$0xff]   ;;  %v777_v15 = vld [vmem:[#allocation7 + $0x28] sm:$0xff]   ;;  %p867_p11 = scmp.ne.s32.totalorder %s1176_s7, %s866_s16  ;;  %s945_s9 = smov [#allocation8]  }
  0x6e   : > { %v270_v14 = vld [vmem:[%s1151_s17] sm:$0xff]  ;;  %s870_s13 = sshll.u32 %s945_s9, 4  ;;  %s871_s13 = int_to_ptr.vmem [resolvable:$false] %s870_s13 }
  0x6f   : > { %v271_v16 = vpack.c.bf16 %v270_v14, %v270_v14  ;;  %v778_v17 = vld [vmem:[#allocation7 + $0x30] sm:$0xff]   ;;  %v779_v18 = vld [vmem:[#allocation7 + $0x38] sm:$0xff]   ;;  %p868_p1 = pnand %p867_p11, %p1237_p0  ;;  %s872_s29 = scalar_lea.vmem %s871_s13, 256 }
  0x70   : > { %656 = vmatpush3.bf16.msra.mxu0 %v765_v2  ;;  %676 = vmatpush3.bf16.msra.mxu1 %v773_v6  ;;  %v613_v19 = vld [vmem:[%s1220_s2] ss:$0 sm:$0xff]  ;;  %p873_p7 = scmp.lt.s32.totalorder %s1176_s7, %s871_s13  ;;  %p874_p9 = scmp.lt.s32.totalorder %s872_s29, %s866_s16 }
  0x71   : > { %657 = vmatprep.subr.bf16.mxu0 %v943_v0  ;;  %677 = vmatprep.subr.bf16.mxu1 %v943_v0  ;;  %v622_v27 = vld [vmem:[%s1222_s4] ss:$0 sm:$0xff]  ;;  %p869_p3 = pneg %p868_p1 }
  0x72   : > { %p875_p12 = por %p874_p9, %p873_p7 }
  0x74   : > { %658 = vmatpush3.bf16.msra.mxu0 %v766_v3  ;;  %678 = vmatpush3.bf16.msra.mxu1 %v774_v8  ;;  %p876_p2 = pnand %p875_p12, %p869_p3 }
  0x75   : > { %659 = vmatprep.subr.bf16.mxu0 %v943_v0  ;;  %679 = vmatprep.subr.bf16.mxu1 %v943_v0 }
  0x78   : > { %660 = vmatpush3.bf16.msra.mxu0 %v767_v5  ;;  %680 = vmatpush3.bf16.msra.mxu1 %v775_v10 }
  0x79   : > { %661 = vmatprep.subr.bf16.mxu0 %v943_v0  ;;  %681 = vmatprep.subr.bf16.mxu1 %v943_v0 }
  0x7c   : > { %662 = vmatpush3.bf16.msra.mxu0 %v768_v7  ;;  %682 = vmatpush3.bf16.msra.mxu1 %v776_v12 }
  0x7d   : > { %663 = vmatprep.subr.bf16.mxu0 %v943_v0  ;;  %683 = vmatprep.subr.bf16.mxu1 %v943_v0 }
  0x80   : > { %664 = vmatpush3.bf16.msra.mxu0 %v769_v9  ;;  %684 = vmatpush3.bf16.msra.mxu1 %v777_v15 }
  0x81   : > { %665 = vmatprep.subr.bf16.mxu0 %v943_v0  ;;  %685 = vmatprep.subr.bf16.mxu1 %v943_v0 }
  0x84   : > { %666 = vmatpush3.bf16.msra.mxu0 %v770_v11  ;;  %686 = vmatpush3.bf16.msra.mxu1 %v778_v17 }
  0x85   : > { %667 = vmatprep.subr.bf16.mxu0 %v943_v0  ;;  %687 = vmatprep.subr.bf16.mxu1 %v943_v0 }
  0x88   : > { %668 = vmatpush3.bf16.msra.mxu0 %v771_v13  ;;  %688 = vmatpush3.bf16.msra.mxu1 %v779_v18 }
  0x8b   : > { %670 = vmatmul.mubr.bf16.vlgmr.msra.gmra.mrb[0].mxu0 %v271_v16 }
 0x15e   : > { %v377_v20 = vpop.f32.mrb[0].mxu0 }
 0x15f   : > { %v378_v21 = vadd.f32 %v613_v19, %v377_v20  ;;  %v671_v22 = vpop.f32.mrb[1].mxu0 }
 0x160   : > { %v380_v23 = vpop.f32.mrb[2].mxu0 }
 0x161   : > { %v383_v24 = vmax.f32 %v378_v21, 0.0  ;;  %v672_v25 = vpop.f32.mrb[3].mxu0 }
 0x163   : > { %v384_v26 = vpack.c.bf16 %v383_v24, %v383_v24 }
 0x165   : > { %690 = vmatmul.mubr.bf16.vlgmr.msra.gmra.mrb[0].mxu1 %v384_v26 }
 0x238   : > { %v490_v28 = vpop.f32.mrb[0].mxu1 }
 0x239   : > { %v491_v29 = vadd.f32 %v622_v27, %v490_v28  ;;  %v691_v30 = vpop.f32.mrb[1].mxu1 }
 0x23a   : > { %v493_v31 = vpop.f32.mrb[2].mxu1 }
 0x23b   : > { %v496_v32 = vadd.f32 %v491_v29, %v270_v14  ;;  %v692_v33 = vpop.f32.mrb[3].mxu1 }
 0x23d   : > { %497 = vst [vmem:[%s268_s28] sm:$0xff] %v496_v32 }
 0x23e   : > { %879 = shalt.err (!%p876_p2)
}
 0x23f   : > { %s880_s12 = scalar_lea.hbm %s1174_s15, 128  ;;  %s884_s26 = scalar_lea.hbm %s1223_s5, 256 }
 0x240   : > { %p881_p13 = scmp.ne.s32.totalorder %s1174_s15, %s880_s12  ;;  %p885_p4 = scmp.lt.u32.totalorder %s1174_s15, %s1223_s5 }
 0x241   : > { %p886_p5 = scmp.lt.u32.totalorder %s884_s26, %s880_s12  ;;  %p888_p11 = scmp.lt.u32.totalorder %s880_s12, %s1174_s15 }
 0x242   : > { %p882_p6 = pnand %p881_p13, %p1237_p0 }
 0x243   : > { %p887_p8 = por %p886_p5, %p885_p4 }
 0x244   : > { %p883_p10 = pneg %p882_p6 }
 0x245   : > { %p889_p1 = por %p888_p11, %p887_p8 }
 0x247   : > { %p890_p3 = pnand %p889_p1, %p883_p10 }
 0x249   : > { %893 = shalt.err (!%p890_p3)
}
 0x24a   : > { %703 = dma.vmem_to_hbm [thread:$0]  (%p1237_p0), %s1176_s7, 128, %s1174_s15, %s499_s22  }
 0x24b PF: > { %s524_s11 = sand.u32 1, %s924_s18   ;;  %p1238_p7 = scmp.ne.s32.totalorder %s1228_s25, 0 }
 0x24c   : > { %p1239_p9 = scmp.ge.s32.totalorder %s936_s21, 2  ;;  %s525_s28 = scalar_lea.sflag [#allocation4], %s524_s11 }
 0x24e   : > { %p717_p12 = pnand %p1239_p9, %p1238_p7 }
 0x250   : > { %919 = dma.done.wait (!%p717_p12), %s525_s28, 128  }
 0x251   : > { %921 = vsyncadd (!%p717_p12), %s525_s28, 4294967168  ;;  %p19_p2 = scmp.ge.s32.totalorder %s1086_s14, 4   ;;  %s1240_s18 = smov %s928_s19 }
 0x252   : > { %s1241_s19 = smov %s932_s20  ;;  %s1242_s20 = smov %s1102_s27 }
 0x253   : > { %s1243_s21 = smov %s1086_s14  ;;  %21 = sbr.rel (!%p19_p2) target bundleno = 6 (0x6), region = 93 }
 0x25a   :  { %530 = vsyncpa [#allocation3], 1 }
 0x25b   :  { %532 = vsyncpa [#allocation3 + $0x1], 1 }
 0x25c   :  { %533 = vsyncpa [#allocation6], 1 }
 0x25d   :  { %534 = vsyncpa [#allocation4], 1 }
 0x25e   :  { %536 = vsyncpa [#allocation4 + $0x1], 1 }

</bundles_post_ra>
